<compile_context>
chip_gen: v7x
topology: tpu7x:2x2x1
jax: 0.10.0
libtpu: 0.0.40
codegen_flags: <defaults>
</compile_context>

<pallas_src>
import jax
import jax.numpy as jnp
from jax.experimental import pallas as pl
from jax.experimental.pallas import tpu as pltpu  # noqa: F401  (kept for TPU-specific params if needed)

# ---------------------------------------------------------------------------
# Problem sizes (small, deterministic):
#   network: x0(D0) -W1,b1-> z1(D1) -relu-> -W2,b2-> z2(D2) -relu-> -W3,b3-> z3(DOUT)
#   output constraints: H z3 + d <= 0   (M constraints)
#   B objectives = [+I ; -I] over the output neurons (get_C_for_layer(last)).
# ---------------------------------------------------------------------------
D0, D1, D2, DOUT, M = 32, 32, 32, 8, 8
B = 2 * DOUT          # 16 objective rows, all handled in one kernel invocation
P = 32                # uniform (zero-padded) lane width used inside the kernel
N_VEC = 16            # rows in the packed per-neuron vector slab (12 used)

# Row indices inside the packed vector slab (rows 4*P .. 4*P+N_VEC-1 of params)
_R_D, _R_B3, _R_B2, _R_B1 = 0, 1, 2, 3
_R_CP2, _R_CN2, _R_GC2 = 4, 5, 6
_R_CP1, _R_CN1, _R_GC1 = 7, 8, 9
_R_L0, _R_U0 = 10, 11


def solver_forward_kernel(gamma_ref, C_ref, params_ref, out_ref):
    f32 = jnp.float32

    # Static slices of the packed parameter slab (free: no data movement).
    Hp = params_ref[0 * P:1 * P, :]        # (P, P)  H, zero-padded rows/cols
    W3p = params_ref[1 * P:2 * P, :]       # (P, P)  W3, zero-padded rows
    W2p = params_ref[2 * P:3 * P, :]       # (P, P)
    W1p = params_ref[3 * P:4 * P, :]       # (P, P)

    def vrow(r):                           # (1, P) per-neuron constant row
        return params_ref[4 * P + r:4 * P + r + 1, :]

    gamma = gamma_ref[...]                 # (B, P), zero past lane M

    # ---- output solver layer: V = C - gamma @ H ;  acc lanes <- -gamma*d ---
    V = C_ref[...] - jnp.dot(gamma, Hp, preferred_element_type=f32)
    acc = -gamma * vrow(_R_D)              # lane-vector accumulator (B, P)

    # ---- solvable layer 2: linear (W3, b3) then ReLU relaxation ------------
    acc = acc + V * vrow(_R_B3)
    vhat = jnp.dot(V, W3p, preferred_element_type=f32)
    pos = vhat >= 0.0
    V = vhat * jnp.where(pos, vrow(_R_CP2), vrow(_R_CN2))
    acc = acc + vhat * jnp.where(pos, 0.0, vrow(_R_GC2))

    # ---- solvable layer 1: linear (W2, b2) then ReLU relaxation ------------
    acc = acc + V * vrow(_R_B2)
    vhat = jnp.dot(V, W2p, preferred_element_type=f32)
    pos = vhat >= 0.0
    V = vhat * jnp.where(pos, vrow(_R_CP1), vrow(_R_CN1))
    acc = acc + vhat * jnp.where(pos, 0.0, vrow(_R_GC1))

    # ---- input solver layer: linear (W1, b1), min over box [L0, U0] --------
    acc = acc + V * vrow(_R_B1)
    V0 = jnp.dot(V, W1p, preferred_element_type=f32)     # theta (B, D0)
    acc = acc + V0 * jnp.where(V0 >= 0.0, vrow(_R_L0), vrow(_R_U0))

    obj = jnp.sum(acc, axis=-1, keepdims=True)           # single XLU reduce
    # Lane-dense 128-wide store: [theta | objective broadcast].
    out_ref[...] = jnp.concatenate(
        [V0, jnp.broadcast_to(obj, (V0.shape[0], 3 * P))], axis=-1)


def _relu_relax_coefs(L, U, pi):
    """Batch-independent per-neuron constants for the ReLU lower relaxation."""
    stab_act = L >= 0.0
    stab_deact = U <= 0.0
    unstable = jnp.logical_and(jnp.logical_not(stab_act),
                               jnp.logical_not(stab_deact))
    denom = jnp.where(unstable, U - L, 1.0)
    slope_up = U / denom
    coef_pos = jnp.where(stab_act, 1.0, jnp.where(stab_deact, 0.0, pi))
    coef_neg = jnp.where(stab_act, 1.0, jnp.where(stab_deact, 0.0, slope_up))
    gap_coef = jnp.where(unstable, -(U * L) / denom, 0.0)
    return coef_pos, coef_neg, gap_coef


def solver_forward(gamma, H, d, C, W3, b3, W2, b2, L2, U2, pi2,
                   W1, b1, L1, U1, pi1, L0, U0):
    """Packs everything into 3 inputs and runs the fused grid-less kernel."""
    f32 = jnp.float32
    pad_lane = lambda x: jnp.pad(x.astype(f32), ((0, 0), (0, P - x.shape[1])))

    gamma_p = pad_lane(gamma)                                     # (B, P)
    C_p = pad_lane(C)                                             # (B, P)
    H_p = jnp.pad(H.astype(f32), ((0, P - M), (0, P - DOUT)))     # (P, P)
    W3_p = jnp.pad(W3.astype(f32), ((0, P - DOUT), (0, 0)))       # (P, P)

    cp2, cn2, gc2 = _relu_relax_coefs(L2, U2, pi2)
    cp1, cn1, gc1 = _relu_relax_coefs(L1, U1, pi1)

    vec = jnp.concatenate([
        pad_lane(d), pad_lane(b3), b2.astype(f32), b1.astype(f32),
        cp2, cn2, gc2, cp1, cn1, gc1,
        L0.astype(f32), U0.astype(f32),
        jnp.zeros((N_VEC - 12, P), f32),
    ], axis=0)                                                    # (N_VEC, P)

    params = jnp.concatenate(
        [H_p, W3_p, W2.astype(f32), W1.astype(f32), vec], axis=0)  # (4P+16, P)

    out = pl.pallas_call(
        solver_forward_kernel,
        out_shape=jax.ShapeDtypeStruct((B, 4 * P), f32),
    )(gamma_p, C_p, params)

    max_objective = out[:, P]        # any broadcast column carries the objective
    theta = out[:, :D0]
    return max_objective, theta


# ---------------------------------------------------------------------------
# Pure-JAX reference (independent implementation of the same math).
# ---------------------------------------------------------------------------
def _relax_relu_ref(vhat, L, U, pi, acc):
    stab_act = L >= 0.0
    stab_deact = U <= 0.0
    unstable = jnp.logical_and(jnp.logical_not(stab_act),
                               jnp.logical_not(stab_deact))
    denom = jnp.where(unstable, U - L, 1.0)
    slope_up = U / denom
    v_pos = jnp.maximum(vhat, 0.0)
    v_neg = jnp.maximum(-vhat, 0.0)
    v_unstable = pi * v_pos - slope_up * v_neg
    v_new = jnp.where(stab_act, vhat, jnp.where(stab_deact, 0.0, v_unstable))
    gap = jnp.where(unstable, (U * L / denom) * v_neg, 0.0)
    acc = acc + jnp.sum(gap, axis=-1, keepdims=True)
    return v_new, acc


def _ref_forward(gamma, H, d, C, W3, b3, W2, b2, L2, U2, pi2,
                 W1, b1, L1, U1, pi1, L0, U0):
    V = C - gamma @ H
    acc = -jnp.sum(gamma * d, -1, keepdims=True)
    acc = acc + jnp.sum(V * b3, -1, keepdims=True)
    V, acc = _relax_relu_ref(V @ W3, L2, U2, pi2, acc)
    acc = acc + jnp.sum(V * b2, -1, keepdims=True)
    V, acc = _relax_relu_ref(V @ W2, L1, U1, pi1, acc)
    acc = acc + jnp.sum(V * b1, -1, keepdims=True)
    V0 = V @ W1
    obj = acc + jnp.sum(jnp.maximum(V0, 0.0) * L0 - jnp.maximum(-V0, 0.0) * U0,
                        -1, keepdims=True)
    return obj[:, 0], V0


if __name__ == "__main__":
    key = jax.random.PRNGKey(0)
    ks = jax.random.split(key, 12)

    # Network weights / biases (deterministic, Linear-style fan-in scaling).
    W1 = jax.random.normal(ks[0], (D1, D0), jnp.float32) / jnp.sqrt(D0)
    b1 = jax.random.normal(ks[1], (1, D1), jnp.float32) * 0.1
    W2 = jax.random.normal(ks[2], (D2, D1), jnp.float32) / jnp.sqrt(D1)
    b2 = jax.random.normal(ks[3], (1, D2), jnp.float32) * 0.1
    W3 = jax.random.normal(ks[4], (DOUT, D2), jnp.float32) / jnp.sqrt(D2)
    b3 = jax.random.normal(ks[5], (1, DOUT), jnp.float32) * 0.1

    # Output constraints  H z + d <= 0.
    H = jax.random.normal(ks[6], (M, DOUT), jnp.float32)
    d = jax.random.normal(ks[7], (1, M), jnp.float32)

    # Intermediate pre-activation bounds (mix of stable / unstable neurons).
    def make_bounds(k, dim):
        kc, kr = jax.random.split(k)
        c = jax.random.normal(kc, (1, dim), jnp.float32) * 0.5
        r = jnp.abs(jax.random.normal(kr, (1, dim), jnp.float32)) * 0.5 + 0.1
        return c - r, c + r

    L1b, U1b = make_bounds(ks[8], D1)
    L2b, U2b = make_bounds(ks[9], D2)

    # Input box.
    x0 = jax.random.normal(ks[10], (1, D0), jnp.float32)
    L0, U0 = x0 - 0.1, x0 + 0.1

    # Learnable solver parameters (clamped as clamp_parameters() would).
    kp = jax.random.split(ks[11], 3)
    gamma = jnp.clip(jax.random.normal(kp[0], (B, M), jnp.float32), 0.0, None)
    pi1 = jnp.clip(jax.random.uniform(kp[1], (1, D1), jnp.float32), 0.0, 1.0)
    pi2 = jnp.clip(jax.random.uniform(kp[2], (1, D2), jnp.float32), 0.0, 1.0)

    # C from get_C_for_layer(last_layer): +/- identity over output neurons.
    C = jnp.concatenate([jnp.eye(DOUT, dtype=jnp.float32),
                         -jnp.eye(DOUT, dtype=jnp.float32)], axis=0)  # (B, DOUT)

    args = (gamma, H, d, C, W3, b3, W2, b2, L2b, U2b, pi2,
            W1, b1, L1b, U1b, pi1, L0, U0)

    max_objective, theta = jax.jit(solver_forward)(*args)
    jax.block_until_ready((max_objective, theta))

    ref_obj, ref_theta = _ref_forward(*args)
    assert max_objective.shape == (B,) and theta.shape == (B, D0)
    assert jnp.allclose(max_objective, ref_obj, atol=1e-3, rtol=1e-3)
    assert jnp.allclose(theta, ref_theta, atol=1e-3, rtol=1e-3)

    print("KERNEL_OK")
</pallas_src>

<mosaic_0001>
module attributes {stable_mosaic.version = 11 : i64} {
  func.func @solver_forward_kernel(%arg0: memref<16x32xf32, #tpu.memory_space<vmem>>, %arg1: memref<16x32xf32, #tpu.memory_space<vmem>>, %arg2: memref<144x32xf32, #tpu.memory_space<vmem>>, %arg3: memref<16x128xf32, #tpu.memory_space<vmem>>) attributes {dimension_semantics = [], scalar_prefetch = 0 : i64, scratch_operands = 0 : i64, tpu.core_type = #tpu.core_type<tc>} {
    %c0 = arith.constant 0 : index
    %c0_0 = arith.constant 0 : index
    %0 = vector.load %arg2[%c0, %c0_0] : memref<144x32xf32, #tpu.memory_space<vmem>>, vector<32x32xf32>
    %c32 = arith.constant 32 : index
    %c0_1 = arith.constant 0 : index
    %1 = vector.load %arg2[%c32, %c0_1] : memref<144x32xf32, #tpu.memory_space<vmem>>, vector<32x32xf32>
    %c64 = arith.constant 64 : index
    %c0_2 = arith.constant 0 : index
    %2 = vector.load %arg2[%c64, %c0_2] : memref<144x32xf32, #tpu.memory_space<vmem>>, vector<32x32xf32>
    %c96 = arith.constant 96 : index
    %c0_3 = arith.constant 0 : index
    %3 = vector.load %arg2[%c96, %c0_3] : memref<144x32xf32, #tpu.memory_space<vmem>>, vector<32x32xf32>
    %c0_4 = arith.constant 0 : index
    %c0_5 = arith.constant 0 : index
    %4 = vector.load %arg0[%c0_4, %c0_5] : memref<16x32xf32, #tpu.memory_space<vmem>>, vector<16x32xf32>
    %c0_6 = arith.constant 0 : index
    %c0_7 = arith.constant 0 : index
    %5 = vector.load %arg1[%c0_6, %c0_7] : memref<16x32xf32, #tpu.memory_space<vmem>>, vector<16x32xf32>
    %cst = arith.constant dense<0.000000e+00> : vector<16x32xf32>
    %6 = tpu.matmul %4, %0, %cst {dimension_numbers = #tpu.dot_dimension_numbers<[1], [0], [0], [1], [0, 0, 1, 1], [], []>} : vector<16x32xf32>, vector<32x32xf32>, vector<16x32xf32> -> vector<16x32xf32>
    %7 = arith.subf %5, %6 : vector<16x32xf32>
    %cst_8 = arith.constant 0.000000e+00 : f32
    %8 = vector.broadcast %cst_8 : f32 to vector<16x32xf32>
    %9 = arith.subf %8, %4 : vector<16x32xf32>
    %c128 = arith.constant 128 : index
    %c0_9 = arith.constant 0 : index
    %10 = vector.load %arg2[%c128, %c0_9] : memref<144x32xf32, #tpu.memory_space<vmem>>, vector<1x32xf32>
    %11 = vector.broadcast %10 : vector<1x32xf32> to vector<16x32xf32>
    %12 = arith.mulf %9, %11 : vector<16x32xf32>
    %c129 = arith.constant 129 : index
    %c0_10 = arith.constant 0 : index
    %13 = vector.load %arg2[%c129, %c0_10] : memref<144x32xf32, #tpu.memory_space<vmem>>, vector<1x32xf32>
    %14 = vector.broadcast %13 : vector<1x32xf32> to vector<16x32xf32>
    %15 = arith.mulf %7, %14 : vector<16x32xf32>
    %16 = arith.addf %12, %15 : vector<16x32xf32>
    %cst_11 = arith.constant dense<0.000000e+00> : vector<16x32xf32>
    %17 = tpu.matmul %7, %1, %cst_11 {dimension_numbers = #tpu.dot_dimension_numbers<[1], [0], [0], [1], [0, 0, 1, 1], [], []>} : vector<16x32xf32>, vector<32x32xf32>, vector<16x32xf32> -> vector<16x32xf32>
    %cst_12 = arith.constant 0.000000e+00 : f32
    %18 = vector.broadcast %cst_12 : f32 to vector<16x32xf32>
    %19 = arith.cmpf oge, %17, %18 : vector<16x32xf32>
    %c132 = arith.constant 132 : index
    %c0_13 = arith.constant 0 : index
    %20 = vector.load %arg2[%c132, %c0_13] : memref<144x32xf32, #tpu.memory_space<vmem>>, vector<1x32xf32>
    %c133 = arith.constant 133 : index
    %c0_14 = arith.constant 0 : index
    %21 = vector.load %arg2[%c133, %c0_14] : memref<144x32xf32, #tpu.memory_space<vmem>>, vector<1x32xf32>
    %22 = vector.shape_cast %20 : vector<1x32xf32> to vector<1x32xf32>
    %23 = vector.broadcast %22 : vector<1x32xf32> to vector<16x32xf32>
    %24 = vector.shape_cast %21 : vector<1x32xf32> to vector<1x32xf32>
    %25 = vector.broadcast %24 : vector<1x32xf32> to vector<16x32xf32>
    %26 = arith.select %19, %23, %25 : vector<16x32xi1>, vector<16x32xf32>
    %27 = arith.mulf %17, %26 : vector<16x32xf32>
    %c134 = arith.constant 134 : index
    %c0_15 = arith.constant 0 : index
    %28 = vector.load %arg2[%c134, %c0_15] : memref<144x32xf32, #tpu.memory_space<vmem>>, vector<1x32xf32>
    %cst_16 = arith.constant 0.000000e+00 : f32
    %29 = vector.broadcast %cst_16 : f32 to vector<16x32xf32>
    %30 = vector.shape_cast %28 : vector<1x32xf32> to vector<1x32xf32>
    %31 = vector.broadcast %30 : vector<1x32xf32> to vector<16x32xf32>
    %32 = arith.select %19, %29, %31 : vector<16x32xi1>, vector<16x32xf32>
    %33 = arith.mulf %17, %32 : vector<16x32xf32>
    %34 = arith.addf %16, %33 : vector<16x32xf32>
    %c130 = arith.constant 130 : index
    %c0_17 = arith.constant 0 : index
    %35 = vector.load %arg2[%c130, %c0_17] : memref<144x32xf32, #tpu.memory_space<vmem>>, vector<1x32xf32>
    %36 = vector.broadcast %35 : vector<1x32xf32> to vector<16x32xf32>
    %37 = arith.mulf %27, %36 : vector<16x32xf32>
    %38 = arith.addf %34, %37 : vector<16x32xf32>
    %cst_18 = arith.constant dense<0.000000e+00> : vector<16x32xf32>
    %39 = tpu.matmul %27, %2, %cst_18 {dimension_numbers = #tpu.dot_dimension_numbers<[1], [0], [0], [1], [0, 0, 1, 1], [], []>} : vector<16x32xf32>, vector<32x32xf32>, vector<16x32xf32> -> vector<16x32xf32>
    %cst_19 = arith.constant 0.000000e+00 : f32
    %40 = vector.broadcast %cst_19 : f32 to vector<16x32xf32>
    %41 = arith.cmpf oge, %39, %40 : vector<16x32xf32>
    %c135 = arith.constant 135 : index
    %c0_20 = arith.constant 0 : index
    %42 = vector.load %arg2[%c135, %c0_20] : memref<144x32xf32, #tpu.memory_space<vmem>>, vector<1x32xf32>
    %c136 = arith.constant 136 : index
    %c0_21 = arith.constant 0 : index
    %43 = vector.load %arg2[%c136, %c0_21] : memref<144x32xf32, #tpu.memory_space<vmem>>, vector<1x32xf32>
    %44 = vector.shape_cast %42 : vector<1x32xf32> to vector<1x32xf32>
    %45 = vector.broadcast %44 : vector<1x32xf32> to vector<16x32xf32>
    %46 = vector.shape_cast %43 : vector<1x32xf32> to vector<1x32xf32>
    %47 = vector.broadcast %46 : vector<1x32xf32> to vector<16x32xf32>
    %48 = arith.select %41, %45, %47 : vector<16x32xi1>, vector<16x32xf32>
    %49 = arith.mulf %39, %48 : vector<16x32xf32>
    %c137 = arith.constant 137 : index
    %c0_22 = arith.constant 0 : index
    %50 = vector.load %arg2[%c137, %c0_22] : memref<144x32xf32, #tpu.memory_space<vmem>>, vector<1x32xf32>
    %cst_23 = arith.constant 0.000000e+00 : f32
    %51 = vector.broadcast %cst_23 : f32 to vector<16x32xf32>
    %52 = vector.shape_cast %50 : vector<1x32xf32> to vector<1x32xf32>
    %53 = vector.broadcast %52 : vector<1x32xf32> to vector<16x32xf32>
    %54 = arith.select %41, %51, %53 : vector<16x32xi1>, vector<16x32xf32>
    %55 = arith.mulf %39, %54 : vector<16x32xf32>
    %56 = arith.addf %38, %55 : vector<16x32xf32>
    %c131 = arith.constant 131 : index
    %c0_24 = arith.constant 0 : index
    %57 = vector.load %arg2[%c131, %c0_24] : memref<144x32xf32, #tpu.memory_space<vmem>>, vector<1x32xf32>
    %58 = vector.broadcast %57 : vector<1x32xf32> to vector<16x32xf32>
    %59 = arith.mulf %49, %58 : vector<16x32xf32>
    %60 = arith.addf %56, %59 : vector<16x32xf32>
    %cst_25 = arith.constant dense<0.000000e+00> : vector<16x32xf32>
    %61 = tpu.matmul %49, %3, %cst_25 {dimension_numbers = #tpu.dot_dimension_numbers<[1], [0], [0], [1], [0, 0, 1, 1], [], []>} : vector<16x32xf32>, vector<32x32xf32>, vector<16x32xf32> -> vector<16x32xf32>
    %cst_26 = arith.constant 0.000000e+00 : f32
    %62 = vector.broadcast %cst_26 : f32 to vector<16x32xf32>
    %63 = arith.cmpf oge, %61, %62 : vector<16x32xf32>
    %c138 = arith.constant 138 : index
    %c0_27 = arith.constant 0 : index
    %64 = vector.load %arg2[%c138, %c0_27] : memref<144x32xf32, #tpu.memory_space<vmem>>, vector<1x32xf32>
    %c139 = arith.constant 139 : index
    %c0_28 = arith.constant 0 : index
    %65 = vector.load %arg2[%c139, %c0_28] : memref<144x32xf32, #tpu.memory_space<vmem>>, vector<1x32xf32>
    %66 = vector.shape_cast %64 : vector<1x32xf32> to vector<1x32xf32>
    %67 = vector.broadcast %66 : vector<1x32xf32> to vector<16x32xf32>
    %68 = vector.shape_cast %65 : vector<1x32xf32> to vector<1x32xf32>
    %69 = vector.broadcast %68 : vector<1x32xf32> to vector<16x32xf32>
    %70 = arith.select %63, %67, %69 : vector<16x32xi1>, vector<16x32xf32>
    %71 = arith.mulf %61, %70 : vector<16x32xf32>
    %72 = arith.addf %60, %71 : vector<16x32xf32>
    %cst_29 = arith.constant dense<0.000000e+00> : vector<16xf32>
    %73 = vector.multi_reduction <add>, %72, %cst_29 [1] : vector<16x32xf32> to vector<16xf32>
    %74 = vector.shape_cast %73 : vector<16xf32> to vector<16x1xf32>
    %75 = vector.shape_cast %74 : vector<16x1xf32> to vector<16x1xf32>
    %76 = vector.broadcast %75 : vector<16x1xf32> to vector<16x96xf32>
    %77 = tpu.concatenate %61, %76 in 1 : vector<16x32xf32>, vector<16x96xf32> -> vector<16x128xf32>
    %c0_30 = arith.constant 0 : index
    %c0_31 = arith.constant 0 : index
    %78 = vector.load %arg3[%c0_30, %c0_31] : memref<16x128xf32, #tpu.memory_space<vmem>>, vector<16x128xf32>
    tpu.vector_store %arg3[%c0_30, %c0_31], %77 {strides = array<i32>} : memref<16x128xf32, #tpu.memory_space<vmem>>, vector<16x128xf32>,
    return
  }
}

</mosaic_0001>

<bundles_post_ra>
// kernel: solver_forward.1
= control target key start
LH: loop header
LB: loop body
LE: loop exit
PB: predicated region body
PF: predicated region fallthrough
CT: control target
= control target key end

     0   :  { %vm34_vm0 = vcmask 261120   ;;  %s737_s2 = inlined_call_operand.vmem [shape: f32[144,32], index: 2, kind: input, shape index: {}]   ;;  %s738_s0 = inlined_call_operand.vmem [shape: f32[16,32], index: 0, kind: input, shape index: {}]   ;;  %s739_s1 = inlined_call_operand.vmem [shape: f32[16,32], index: 1, kind: input, shape index: {}]   ;;  %s740_s3 = inlined_call_operand.vmem [shape: f32[16,128], index: 3, kind: output, shape index: {}]  }
   0x1   :  { %v14_v0 = vld [vmem:[%s737_s2] sm:$0xff]  ;;  %v15_v1 = vld [vmem:[%s737_s2 + $0x8] sm:$0xff]  ;;  %v16_v2 = vld [vmem:[%s737_s2 + $0x10] sm:$0xff] }
   0x2   :  { %v571_v3 = vpack.c.bf16 %v15_v1, %v14_v0  ;;  %v17_v4 = vld [vmem:[%s737_s2 + $0x18] sm:$0xff]  ;;  %v30_v5 = vld [vmem:[%s738_s0] sm:$0xff]  ;;  %v19_v8 = vld [vmem:[%s737_s2 + $0x28] sm:$0xff] }
   0x3   :  { %v575_v6 = vpack.c.bf16 %v17_v4, %v16_v2  ;;  %535 = vmatprep.mubr.msk.f32.mxu0 %vm34_vm0, %v30_v5  ;;  %v18_v7 = vld [vmem:[%s737_s2 + $0x20] sm:$0xff]  ;;  %v31_v10 = vld [vmem:[%s738_s0 + $0x8] sm:$0xff]  ;;  %v20_v11 = vld [vmem:[%s737_s2 + $0x30] sm:$0xff]  ;;  %v118_v18 = vsub.f32 0.0, %v30_v5 }
   0x4   :  { %572 = vmatprep.subr.bf16.mxu0 %v571_v3  ;;  %v579_v9 = vpack.c.bf16 %v19_v8, %v18_v7  ;;  %v21_v12 = vld [vmem:[%s737_s2 + $0x38] sm:$0xff]  ;;  %v22_v14 = vld [vmem:[%s737_s2 + $0x40] sm:$0xff]  ;;  %v23_v15 = vld [vmem:[%s737_s2 + $0x48] sm:$0xff]  ;;  %v119_v17 = vsub.f32 0.0, %v31_v10 }
   0x5   :  { %574 = vmatpush3.bf16.msra.mxu0 %v571_v3  ;;  %v583_v13 = vpack.c.bf16 %v21_v12, %v20_v11  ;;  %v587_v16 = vpack.c.bf16 %v23_v15, %v22_v14  ;;  %v485_v19 = vld [vmem:[%s737_s2 + $0x80] ss:$0 sm:$0xff]  ;;  %v33_v20 = vld [vmem:[%s739_s1 + $0x8] sm:$0xff]  ;;  %v486_v23 = vld [vmem:[%s737_s2 + $0x81] ss:$0 sm:$0xff] }
   0x6   :  { %576 = vmatprep.subr.bf16.mxu0 %v575_v6  ;;  %580 = vmatprep.subr.bf16.mxu1 %v579_v9  ;;  %v32_v21 = vld [vmem:[%s739_s1] sm:$0xff]  ;;  %v126_v24 = vmul.f32 %v485_v19, %v119_v17  ;;  %v125_v27 = vmul.f32 %v485_v19, %v118_v18  ;;  %v24_v33 = vld [vmem:[%s737_s2 + $0x50] sm:$0xff]  ;;  %v25_v34 = vld [vmem:[%s737_s2 + $0x58] sm:$0xff] }
   0x7   :  { %582 = vmatpush3.bf16.msra.mxu1 %v579_v9  ;;  %v591_v35 = vpack.c.bf16 %v25_v34, %v24_v33  ;;  %v26_v36 = vld [vmem:[%s737_s2 + $0x60] sm:$0xff]  ;;  %v27_v37 = vld [vmem:[%s737_s2 + $0x68] sm:$0xff]  ;;  %v28_v59 = vld [vmem:[%s737_s2 + $0x70] sm:$0xff] }
   0x8   :  { %584 = vmatprep.subr.bf16.mxu1 %v583_v13  ;;  %v595_v38 = vpack.c.bf16 %v27_v37, %v26_v36  ;;  %v489_v39 = vld [vmem:[%s737_s2 + $0x84] ss:$0 sm:$0xff]  ;;  %v490_v40 = vld [vmem:[%s737_s2 + $0x85] ss:$0 sm:$0xff]  ;;  %v491_v41 = vld [vmem:[%s737_s2 + $0x86] ss:$0 sm:$0xff] }
   0x9   :  { %578 = vmatpush3.bf16.msra.mxu0 %v575_v6  ;;  %v492_v46 = vld [vmem:[%s737_s2 + $0x82] ss:$0 sm:$0xff]  ;;  %v29_v60 = vld [vmem:[%s737_s2 + $0x78] sm:$0xff]  ;;  %v495_v62 = vld [vmem:[%s737_s2 + $0x87] ss:$0 sm:$0xff] }
   0xa   :  { %588 = vmatprep.subr.bf16.mxu0 %v587_v16  ;;  %v599_v61 = vpack.c.bf16 %v29_v60, %v28_v59  ;;  %v496_v63 = vld [vmem:[%s737_s2 + $0x88] ss:$0 sm:$0xff]  ;;  %v497_v0 = vld [vmem:[%s737_s2 + $0x89] ss:$0 sm:$0xff]  ;;  %v498_v5 = vld [vmem:[%s737_s2 + $0x83] ss:$0 sm:$0xff] }
   0xb   :  { %586 = vmatpush3.bf16.msra.mxu1 %v583_v13  ;;  %v501_v18 = vld [vmem:[%s737_s2 + $0x8a] ss:$0 sm:$0xff]  ;;  %v502_v19 = vld [vmem:[%s737_s2 + $0x8b] ss:$0 sm:$0xff] }
   0xc   :  { %536 = vmatmul.mubr.msk.f32.vlgmr.msra.gmra.mrb[0].mxu0 %vm34_vm0, %v31_v10  ;;  %596 = vmatprep.subr.bf16.mxu1 %v595_v38 }
   0xd   :  { %590 = vmatpush3.bf16.msra.mxu0 %v587_v16 }
   0xe   :  { %592 = vmatprep.subr.bf16.mxu0 %v591_v35 }
  0x11   :  { %594 = vmatpush3.bf16.msra.mxu0 %v591_v35 }
  0xdf   :  { %v537_v22 = vpop.f32.mrb[0].mxu0 }
  0xe0   :  { %v117_v25 = vsub.f32 %v33_v20, %v537_v22  ;;  %v107_v26 = vpop.f32.mrb[1].mxu0 }
  0xe1   :  { %v116_v28 = vsub.f32 %v32_v21, %v107_v26 }
  0xe2   :  { %v133_v29 = vmul.f32 %v486_v23, %v117_v25 }
  0xe3   :  { %v132_v30 = vmul.f32 %v486_v23, %v116_v28  ;;  %546 = vmatprep.mubr.msk.f32.mxu1 %vm34_vm0, %v116_v28 }
  0xe4   :  { %v135_v31 = vadd.f32 %v133_v29, %v126_v24  ;;  %547 = vmatmul.mubr.msk.f32.vlgmr.msra.gmra.mrb[0].mxu1 %vm34_vm0, %v117_v25 }
  0xe5   :  { %v134_v32 = vadd.f32 %v132_v30, %v125_v27  ;;  %598 = vmatpush3.bf16.msra.mxu1 %v595_v38 }
  0xe6   :  { %600 = vmatprep.subr.bf16.mxu1 %v599_v61 }
  0xe9   :  { %602 = vmatpush3.bf16.msra.mxu1 %v599_v61 }
 0x1b7   :  { %v548_v42 = vpop.f32.mrb[0].mxu1 }
 0x1b8   :  { %vm218_vm1 = vcmp.ge.f32.partialorder %v548_v42, 0.0  ;;  %v208_v43 = vpop.f32.mrb[1].mxu1 }
 0x1b9   :  { %v230_v44 = vsel %vm218_vm1, %v489_v39, %v490_v40  ;;  %v239_v45 = vsel %vm218_vm1, 0.0, %v491_v41  ;;  %vm217_vm2 = vcmp.ge.f32.partialorder %v208_v43, 0.0 }
 0x1ba   :  { %v232_v47 = vmul.f32 %v548_v42, %v230_v44  ;;  %v241_v48 = vmul.f32 %v548_v42, %v239_v45  ;;  %v229_v49 = vsel %vm217_vm2, %v489_v39, %v490_v40  ;;  %v238_v50 = vsel %vm217_vm2, 0.0, %v491_v41 }
 0x1bb   :  { %v231_v51 = vmul.f32 %v229_v49, %v208_v43  ;;  %v240_v52 = vmul.f32 %v238_v50, %v208_v43 }
 0x1bc   :  { %v243_v53 = vadd.f32 %v241_v48, %v135_v31  ;;  %v250_v54 = vmul.f32 %v492_v46, %v232_v47 }
 0x1bd   :  { %v242_v55 = vadd.f32 %v240_v52, %v134_v32  ;;  %v249_v56 = vmul.f32 %v492_v46, %v231_v51  ;;  %557 = vmatprep.mubr.msk.f32.mxu0 %vm34_vm0, %v231_v51 }
 0x1be   :  { %558 = vmatmul.mubr.msk.f32.vlgmr.msra.gmra.mrb[2].mxu0 %vm34_vm0, %v232_v47  ;;  %v252_v57 = vadd.f32 %v250_v54, %v243_v53 }
 0x1bf   :  { %v251_v58 = vadd.f32 %v249_v56, %v242_v55 }
 0x291   :  { %v559_v1 = vpop.f32.mrb[2].mxu0 }
 0x292   :  { %vm335_vm3 = vcmp.ge.f32.partialorder %v559_v1, 0.0  ;;  %v325_v2 = vpop.f32.mrb[3].mxu0 }
 0x293   :  { %v347_v3 = vsel %vm335_vm3, %v495_v62, %v496_v63  ;;  %v356_v4 = vsel %vm335_vm3, 0.0, %v497_v0  ;;  %vm334_vm4 = vcmp.ge.f32.partialorder %v325_v2, 0.0 }
 0x294   :  { %v349_v6 = vmul.f32 %v559_v1, %v347_v3  ;;  %v358_v7 = vmul.f32 %v559_v1, %v356_v4  ;;  %v346_v8 = vsel %vm334_vm4, %v495_v62, %v496_v63  ;;  %v355_v9 = vsel %vm334_vm4, 0.0, %v497_v0 }
 0x295   :  { %v348_v10 = vmul.f32 %v346_v8, %v325_v2  ;;  %v357_v11 = vmul.f32 %v355_v9, %v325_v2 }
 0x296   :  { %v360_v12 = vadd.f32 %v358_v7, %v252_v57  ;;  %v367_v13 = vmul.f32 %v498_v5, %v349_v6 }
 0x297   :  { %v359_v14 = vadd.f32 %v357_v11, %v251_v58  ;;  %v366_v15 = vmul.f32 %v498_v5, %v348_v10  ;;  %568 = vmatprep.mubr.msk.f32.mxu1 %vm34_vm0, %v348_v10 }
 0x298   :  { %569 = vmatmul.mubr.msk.f32.vlgmr.msra.gmra.mrb[2].mxu1 %vm34_vm0, %v349_v6  ;;  %v369_v16 = vadd.f32 %v367_v13, %v360_v12 }
 0x299   :  { %v368_v17 = vadd.f32 %v366_v15, %v359_v14 }
 0x36b   :  { %v570_v20 = vpop.f32.mrb[2].mxu1 }
 0x36c   :  { %vm452_vm5 = vcmp.ge.f32.partialorder %v570_v20, 0.0  ;;  %v442_v21 = vpop.f32.mrb[3].mxu1 }
 0x36d   :  { %v464_v22 = vsel %vm452_vm5, %v501_v18, %v502_v19  ;;  %vm451_vm6 = vcmp.ge.f32.partialorder %v442_v21, 0.0 }
 0x36e   :  { %v466_v23 = vmul.f32 %v570_v20, %v464_v22  ;;  %v463_v24 = vsel %vm451_vm6, %v501_v18, %v502_v19 }
 0x36f   :  { %v465_v25 = vmul.f32 %v463_v24, %v442_v21 }
 0x370   :  { %v468_v26 = vadd.f32 %v466_v23, %v369_v16 }
 0x371   :  { %v467_v27 = vadd.f32 %v465_v25, %v368_v17 }
 0x372   :  { %v472_v29 = vsel %vm34_vm0, %v468_v26, 0.0 }
 0x373   :  { %v469_v28 = vsel %vm34_vm0, %v467_v27, 0.0 }
 0x374   :  { %470 = vadd.xlane.f32.xlu0 %v469_v28 }
 0x378   :  { %473 = vadd.xlane.f32.xlu0 %v472_v29 }
 0x401   :  { %v471_v30 = vpop.xlane.xlu0 %470 }
 0x402   :  { %v475_v31 = vsel %vm34_vm0, %v442_v21, %v471_v30 }
 0x403   :  { %477 = vst [vmem:[%s740_s3] sm:$0xff] %v475_v31 }
 0x405   :  { %v474_v32 = vpop.xlane.xlu0 %473 }
 0x406   :  { %v476_v33 = vsel %vm34_vm0, %v570_v20, %v474_v32 }
 0x407   :  { %478 = vst [vmem:[%s740_s3 + $0x8] sm:$0xff] %v476_v33 }

</bundles_post_ra>
